<compile_context>
chip_gen: v7x
topology: tpu7x:2x2x1
jax: 0.10.0
libtpu: 0.0.40
codegen_flags: <defaults>
</compile_context>

<pallas_src>
import functools
import math

import jax
import jax.numpy as jnp
from jax.experimental import pallas as pl
from jax.experimental.pallas import tpu as pltpu

BN_EPS = 1e-5
_MASK_VAL = -1e30  # finite "minus infinity" -> no NaN risk in max/exp


def _round_up(x, m):
    return (x + m - 1) // m * m


# ------------------------------- kernel ---------------------------------------

def _fused_multi_study_kernel(t_valid_ref, x_ref, w_ref, b_ref, out_ref, *,
                              apply_log_softmax):
    """One (study, batch-tile) grid step: logits = x @ W_comb + b_comb [-> log_softmax].

    Block shapes:  x_ref (1, TB, F), w_ref (1, F, Tp), b_ref (1, 1, Tp),
                   out_ref (1, TB, Tp).  t_valid_ref is an SMEM (S,) int32 array
                   (scalar prefetch) with the true class count per study.
    """
    logits = jnp.dot(x_ref[0], w_ref[0], preferred_element_type=jnp.float32)
    logits = logits + b_ref[0].astype(jnp.float32)
    if apply_log_softmax:
        # Mask the lane-padding columns so the normalizer only sees real classes.
        t_valid = t_valid_ref[pl.program_id(0)]
        col = jax.lax.broadcasted_iota(jnp.int32, logits.shape, 1)
        logits = jnp.where(col < t_valid, logits, _MASK_VAL)
        m = jnp.max(logits, axis=1, keepdims=True)
        lse = jnp.log(jnp.sum(jnp.exp(logits - m), axis=1, keepdims=True)) + m
        logits = logits - lse
    out_ref[0] = logits.astype(out_ref.dtype)


# ------------------------------ wrappers ---------------------------------------

def fold_params(params, studies, compute_dtype=jnp.bfloat16):
    """Fold embedder + BatchNorm(eval) + classifier into one affine map per study.

    One-time cost; reuse the result across all forward calls with the same params.
    Returns (w_all (S,F,Tp) compute_dtype, b_all (S,1,Tp) f32, t_valid (S,) i32,
             t_sizes list).
    """
    w_emb = params["embedder"]["weight"].astype(jnp.float32)   # (F, L) pre-transposed
    b_emb = params["embedder"]["bias"].astype(jnp.float32)     # (L,)
    t_sizes = [int(params["classifiers"][s]["weight"].shape[1]) for s in studies]
    tp = _round_up(max(t_sizes), 128)                          # lane-dense output dim

    w_blocks, b_blocks = [], []
    for study, t in zip(studies, t_sizes):
        p = params["classifiers"][study]
        w_cls = p["weight"].astype(jnp.float32)                # (L, T) pre-transposed
        scale = jax.lax.rsqrt(p["bn_var"].astype(jnp.float32) + BN_EPS)   # (L,)
        w_comb = (w_emb * scale[None, :]) @ w_cls                         # (F, T)
        b_comb = ((b_emb - p["bn_mean"]) * scale) @ w_cls + p["bias"]     # (T,)
        w_blocks.append(jnp.pad(w_comb, ((0, 0), (0, tp - t))))
        b_blocks.append(jnp.pad(b_comb, (0, tp - t)))
    w_all = jnp.stack(w_blocks).astype(compute_dtype)          # (S, F, Tp)
    b_all = jnp.stack(b_blocks)[:, None, :].astype(jnp.float32)  # (S, 1, Tp)
    t_valid = jnp.asarray(t_sizes, jnp.int32)
    return w_all, b_all, t_valid, t_sizes


def fused_multi_study(x_all, w_all, b_all, t_valid, *, logits=False,
                      batch_tile=None):
    """One pallas_call over all studies: grid = (num_studies, batch_tiles)."""
    s_dim, b_pad, f = x_all.shape
    sw, fw, tp = w_all.shape
    assert s_dim == sw and f == fw
    assert b_pad % 8 == 0 and tp % 128 == 0
    tb = batch_tile if batch_tile is not None else min(b_pad, 512)
    assert b_pad % tb == 0

    kernel = functools.partial(_fused_multi_study_kernel,
                               apply_log_softmax=not logits)

    grid_spec = pltpu.PrefetchScalarGridSpec(
        num_scalar_prefetch=1,                     # t_valid -> SMEM
        grid=(s_dim, b_pad // tb),
        in_specs=[
            pl.BlockSpec((1, tb, f), lambda s, i, tv: (s, i, 0)),   # x batch tile
            pl.BlockSpec((1, f, tp), lambda s, i, tv: (s, 0, 0)),   # folded weight
            pl.BlockSpec((1, 1, tp), lambda s, i, tv: (s, 0, 0)),   # folded bias
        ],
        out_specs=pl.BlockSpec((1, tb, tp), lambda s, i, tv: (s, i, 0)),
    )

    cost = pl.CostEstimate(
        flops=2 * s_dim * b_pad * f * tp,
        transcendentals=0 if logits else s_dim * b_pad * tp,
        bytes_accessed=(x_all.size * x_all.dtype.itemsize
                        + w_all.size * w_all.dtype.itemsize
                        + b_all.size * 4
                        + s_dim * b_pad * tp * 4),
    )

    return pl.pallas_call(
        kernel,
        out_shape=jax.ShapeDtypeStruct((s_dim, b_pad, tp), jnp.float32),
        grid_spec=grid_spec,
        compiler_params=pltpu.CompilerParams(
            dimension_semantics=("parallel", "parallel")),
        cost_estimate=cost,
    )(t_valid, x_all, w_all, b_all)


def var_multi_study_forward(inputs, params, logits=False,
                            compute_dtype=jnp.bfloat16, folded=None):
    """inputs: dict[study] -> (B_s, in_features); params: dict of weights."""
    studies = list(inputs.keys())
    if folded is None:
        # In a serving loop, call fold_params once and pass `folded=` to amortize.
        folded = fold_params(params, studies, compute_dtype)
    w_all, b_all, t_valid, t_sizes = folded

    batch_sizes = [inputs[s].shape[0] for s in studies]
    b_pad = _round_up(max(batch_sizes), 8)
    x_all = jnp.stack([
        jnp.pad(inputs[s].astype(compute_dtype),
                ((0, b_pad - inputs[s].shape[0]), (0, 0)))
        for s in studies])                                     # (S, B_pad, F)

    out = fused_multi_study(x_all, w_all, b_all, t_valid, logits=logits)
    return {s: out[i, :batch_sizes[i], :t_sizes[i]]
            for i, s in enumerate(studies)}


# ---------------------- pure-JAX reference (for checking) ----------------------

def reference_forward(inputs, params, logits=False):
    w_emb = params["embedder"]["weight"]
    b_emb = params["embedder"]["bias"]
    preds = {}
    for study, x in inputs.items():
        p = params["classifiers"][study]
        h = x @ w_emb + b_emb
        h = (h - p["bn_mean"]) * jax.lax.rsqrt(p["bn_var"] + BN_EPS)
        lg = h @ p["weight"] + p["bias"]
        preds[study] = lg if logits else jax.nn.log_softmax(lg, axis=1)
    return preds


# ------------------------- deterministic parameter init -------------------------

def _orthogonal(key, rows, cols, gain):
    """Mimic nn.init.orthogonal_ for a (rows, cols) matrix."""
    n, m = max(rows, cols), min(rows, cols)
    a = jax.random.normal(key, (n, m), dtype=jnp.float32)
    q, r = jnp.linalg.qr(a)
    sign = jnp.where(jnp.diag(r) >= 0, 1.0, -1.0)   # avoid sign(0) == 0
    q = q * sign[None, :]
    if rows < cols:
        q = q.T
    return gain * q[:rows, :cols]


def make_params(key, in_features, latent_size, target_sizes):
    keys = jax.random.split(key, 2 + 2 * len(target_sizes))
    # Embedder: torch weight is (latent, in); orthogonal with gain=1/sqrt(in).
    gain = 1.0 / math.sqrt(in_features)
    w_emb_torch = _orthogonal(keys[0], latent_size, in_features, gain)
    params = {
        "embedder": {
            "weight": jnp.asarray(w_emb_torch.T),            # (F, L) pre-transposed
            "bias": jnp.zeros((latent_size,), jnp.float32),  # (L,)
        },
        "classifiers": {},
    }
    for i, (study, tsize) in enumerate(target_sizes.items()):
        kw, kb = keys[2 + 2 * i], keys[3 + 2 * i]
        bound = 1.0 / math.sqrt(latent_size)
        w_cls = jax.random.uniform(kw, (latent_size, tsize), jnp.float32,
                                   -bound, bound)              # (L, T) pre-transposed
        b_cls = jax.random.uniform(kb, (tsize,), jnp.float32, -bound, bound)
        params["classifiers"][study] = {
            "weight": w_cls,
            "bias": b_cls,
            # BatchNorm1d(affine=False) running stats (fresh module: mean=0, var=1)
            "bn_mean": jnp.zeros((latent_size,), jnp.float32),
            "bn_var": jnp.ones((latent_size,), jnp.float32),
        }
    return params


if __name__ == "__main__":
    key = jax.random.PRNGKey(0)
    in_features = 32
    latent_size = 16
    target_sizes = {"archi": 4, "hcp": 6}
    batch = 8

    kparams, kx1, kx2 = jax.random.split(key, 3)
    params = make_params(kparams, in_features, latent_size, target_sizes)

    inputs = {
        "archi": jax.random.normal(kx1, (batch, in_features), jnp.float32),
        "hcp": jax.random.normal(kx2, (batch, in_features), jnp.float32),
    }

    # log_softmax path (default forward behaviour)
    preds = var_multi_study_forward(inputs, params)
    refs = reference_forward(inputs, params)
    for study, out in preds.items():
        out = jax.block_until_ready(out)
        assert out.shape == (batch, target_sizes[study])
        # log_softmax rows must sum (after exp) to ~1
        assert bool(jnp.all(jnp.abs(jnp.sum(jnp.exp(out), axis=1) - 1.0) < 1e-3))
        # matches the unfused pure-JAX reference (bf16 operand tolerance)
        assert bool(jnp.allclose(out, refs[study], atol=3e-2, rtol=3e-2)), (
            study, float(jnp.max(jnp.abs(out - refs[study]))))

    # logits=True path (raw logits, no log_softmax)
    pred_lg = var_multi_study_forward(inputs, params, logits=True)
    ref_lg = reference_forward(inputs, params, logits=True)
    for study in inputs:
        lg = jax.block_until_ready(pred_lg[study])
        assert lg.shape == (batch, target_sizes[study])
        assert bool(jnp.allclose(lg, ref_lg[study], atol=3e-2, rtol=3e-2)), (
            study, float(jnp.max(jnp.abs(lg - ref_lg[study]))))

    print("KERNEL_OK")
</pallas_src>

<mosaic_0001>
module attributes {stable_mosaic.version = 11 : i64} {
  func.func @_fused_multi_study_kernel(%arg0: i32, %arg1: i32, %arg2: memref<2xi32, #tpu.memory_space<smem>>, %arg3: memref<1x8x32xbf16, #tpu.memory_space<vmem>>, %arg4: memref<1x32x128xbf16, #tpu.memory_space<vmem>>, %arg5: memref<1x1x128xf32, #tpu.memory_space<vmem>>, %arg6: memref<1x8x128xf32, #tpu.memory_space<vmem>>) attributes {dimension_semantics = [#tpu.dimension_semantics<parallel>, #tpu.dimension_semantics<parallel>], iteration_bounds = array<i64: 2, 1>, scalar_prefetch = 1 : i64, scratch_operands = 0 : i64, tpu.core_type = #tpu.core_type<tc>, window_params = [{transform_indices = @transform_0, window_bounds = array<i64: 1, 8, 32>}, {transform_indices = @transform_1, window_bounds = array<i64: 1, 32, 128>}, {transform_indices = @transform_2, window_bounds = array<i64: 1, 1, 128>}, {transform_indices = @transform_3, window_bounds = array<i64: 1, 8, 128>}]} {
    %c0 = arith.constant 0 : index
    %c0_0 = arith.constant 0 : index
    %c0_1 = arith.constant 0 : index
    %0 = vector.load %arg3[%c0, %c0_0, %c0_1] : memref<1x8x32xbf16, #tpu.memory_space<vmem>>, vector<1x8x32xbf16>
    %1 = vector.shape_cast %0 : vector<1x8x32xbf16> to vector<8x32xbf16>
    %c0_2 = arith.constant 0 : index
    %c0_3 = arith.constant 0 : index
    %c0_4 = arith.constant 0 : index
    %2 = vector.load %arg4[%c0_2, %c0_3, %c0_4] : memref<1x32x128xbf16, #tpu.memory_space<vmem>>, vector<1x32x128xbf16>
    %3 = vector.shape_cast %2 : vector<1x32x128xbf16> to vector<32x128xbf16>
    %cst = arith.constant dense<0.000000e+00> : vector<8x128xf32>
    %4 = tpu.matmul %1, %3, %cst {dimension_numbers = #tpu.dot_dimension_numbers<[1], [0], [0], [1], [0, 0, 1, 1], [], []>} : vector<8x32xbf16>, vector<32x128xbf16>, vector<8x128xf32> -> vector<8x128xf32>
    %c0_5 = arith.constant 0 : index
    %c0_6 = arith.constant 0 : index
    %c0_7 = arith.constant 0 : index
    %5 = vector.load %arg5[%c0_5, %c0_6, %c0_7] : memref<1x1x128xf32, #tpu.memory_space<vmem>>, vector<1x1x128xf32>
    %6 = vector.shape_cast %5 : vector<1x1x128xf32> to vector<1x128xf32>
    %7 = vector.broadcast %6 : vector<1x128xf32> to vector<8x128xf32>
    %8 = arith.addf %4, %7 : vector<8x128xf32>
    %9 = arith.index_cast %arg0 : i32 to index
    %10 = memref.load %arg2[%9] : memref<2xi32, #tpu.memory_space<smem>>
    %11 = tpu.iota {dimensions = array<i32: 1>} : vector<8x128xi32>
    %12 = vector.broadcast %10 : i32 to vector<8x128xi32>
    %13 = arith.cmpi slt, %11, %12 : vector<8x128xi32>
    %cst_8 = arith.constant -1.000000e+30 : f32
    %14 = vector.broadcast %cst_8 : f32 to vector<8x128xf32>
    %15 = arith.select %13, %8, %14 : vector<8x128xi1>, vector<8x128xf32>
    %cst_9 = arith.constant dense<0xFF800000> : vector<8xf32>
    %16 = vector.multi_reduction <maximumf>, %15, %cst_9 [1] : vector<8x128xf32> to vector<8xf32>
    %17 = vector.shape_cast %16 : vector<8xf32> to vector<8x1xf32>
    %18 = vector.broadcast %17 : vector<8x1xf32> to vector<8x128xf32>
    %19 = arith.subf %15, %18 : vector<8x128xf32>
    %20 = math.exp %19 : vector<8x128xf32>
    %cst_10 = arith.constant dense<0.000000e+00> : vector<8xf32>
    %21 = vector.multi_reduction <add>, %20, %cst_10 [1] : vector<8x128xf32> to vector<8xf32>
    %22 = vector.shape_cast %21 : vector<8xf32> to vector<8x1xf32>
    %23 = math.log %22 : vector<8x1xf32>
    %24 = arith.addf %23, %17 : vector<8x1xf32>
    %25 = vector.broadcast %24 : vector<8x1xf32> to vector<8x128xf32>
    %26 = arith.subf %15, %25 : vector<8x128xf32>
    %c0_11 = arith.constant 0 : index
    %c0_12 = arith.constant 0 : index
    %c0_13 = arith.constant 0 : index
    %27 = vector.load %arg6[%c0_11, %c0_12, %c0_13] : memref<1x8x128xf32, #tpu.memory_space<vmem>>, vector<1x8x128xf32>
    %28 = vector.shape_cast %27 : vector<1x8x128xf32> to vector<8x128xf32>
    %29 = vector.shape_cast %26 : vector<8x128xf32> to vector<1x8x128xf32>
    tpu.vector_store %arg6[%c0_11, %c0_12, %c0_13], %29 {strides = array<i32>} : memref<1x8x128xf32, #tpu.memory_space<vmem>>, vector<1x8x128xf32>,
    return
  }
  func.func @transform_0(%arg0: i32, %arg1: i32, %arg2: memref<2xi32, #tpu.memory_space<smem>>) -> (i32, i32, i32) {
    %c0_i32 = arith.constant 0 : i32
    %c0_i32_0 = arith.constant 0 : i32
    return %arg0, %arg1, %c0_i32 : i32, i32, i32
  }
  func.func @transform_1(%arg0: i32, %arg1: i32, %arg2: memref<2xi32, #tpu.memory_space<smem>>) -> (i32, i32, i32) {
    %c0_i32 = arith.constant 0 : i32
    %c0_i32_0 = arith.constant 0 : i32
    %c0_i32_1 = arith.constant 0 : i32
    return %arg0, %c0_i32, %c0_i32_0 : i32, i32, i32
  }
  func.func @transform_2(%arg0: i32, %arg1: i32, %arg2: memref<2xi32, #tpu.memory_space<smem>>) -> (i32, i32, i32) {
    %c0_i32 = arith.constant 0 : i32
    %c0_i32_0 = arith.constant 0 : i32
    %c0_i32_1 = arith.constant 0 : i32
    return %arg0, %c0_i32, %c0_i32_0 : i32, i32, i32
  }
  func.func @transform_3(%arg0: i32, %arg1: i32, %arg2: memref<2xi32, #tpu.memory_space<smem>>) -> (i32, i32, i32) {
    %c0_i32 = arith.constant 0 : i32
    %c0_i32_0 = arith.constant 0 : i32
    return %arg0, %arg1, %c0_i32 : i32, i32, i32
  }
}

</mosaic_0001>

<bundles_post_ra>
// kernel: tpu_custom_call.1
= control target key start
LH: loop header
LB: loop body
LE: loop exit
PB: predicated region body
PF: predicated region fallthrough
CT: control target
= control target key end

     0   :  { %s1022_s0 = inlined_call_operand.hbm [shape: s32[2], index: 0, kind: input, shape index: {}]   ;;  %s1023_s1 = inlined_call_operand.hbm [shape: bf16[2,8,32], index: 1, kind: input, shape index: {}]   ;;  %s1024_s2 = inlined_call_operand.hbm [shape: bf16[2,32,128], index: 2, kind: input, shape index: {}]   ;;  %s1025_s3 = inlined_call_operand.vmem [shape: f32[2,1,128], index: 3, kind: input, shape index: {}]   ;;  %s1026_s4 = inlined_call_operand.hbm [shape: f32[2,8,128], index: 4, kind: output, shape index: {}]  }
   0x1   :  { %s587_s17 = scalar_lea.hbm %s1022_s0, 16 }
   0x2   :  { %p588_p0 = scmp.ne.s32.totalorder %s1022_s0, %s587_s17  ;;  %p591_p1 = scmp.lt.u32.totalorder %s587_s17, %s1022_s0 }
   0x4   :  { %p593_p2 = pnand %p591_p1, %p588_p0 }
   0x6   :  { %596 = shalt.err (!%p593_p2)  }
   0x7   :  { %s747_s22 = smov [#allocation3]  }
   0x8   :  { %10 = dma.hbm_to_smem %s1022_s0, 16, %s747_s22, [#allocation2] }
   0x9   :  { %709 = dma.done.wait [#allocation2], 16 }
   0xa   :  { %710 = vsyncadd [#allocation2], 4294967280 }
   0xb   :  { %12 = sfence }
   0xc   :  { %13 = vsyncpa [#allocation5], 0 }
   0xd   :  { %15 = vsyncpa [#allocation5 + $0x1], 0 }
   0xe   :  { %16 = vsyncpa [#allocation8], 0 }
   0xf   :  { %18 = vsyncpa [#allocation8 + $0x1], 0 }
  0x10   :  { %19 = vsyncpa [#allocation6], 0 }
  0x11   :  { %21 = vsyncpa [#allocation6 + $0x1], 0  ;;  %s792_s25 = smov 0   ;;  %s794_s26 = smov 0  }
  0x12   :  { %s796_s27 = smov 0   ;;  %s798_s28 = smov 0  }
  0x13   :  { %s800_s29 = smov 0   ;;  %s802_s0 = smov 0  }
  0x14 LB: > { %s476_s30 = sadd.s32 4294967295, %s745_s0   ;;  %s477_s5 = sadd.s32 4294967294, %s745_s0   ;;  %s745_s0 = sphi %s802_s0, %s27_s0   ;;  %s741_s29 = sphi %s800_s29, %s1045_s29   ;;  %s737_s28 = sphi %s798_s28, %s1044_s28   ;;  %s733_s27 = sphi %s796_s27, %s1043_s27   ;;  %s729_s26 = sphi %s794_s26, %s1042_s26   ;;  %s725_s25 = sphi %s792_s25, %s1041_s25  }
  0x15   : > { %s39_s6 = sadd.s32 1, %s741_s29  ;;  %s48_s7 = sadd.s32 1, %s733_s27 }
  0x16   : > { %p41_p3 = scmp.ge.s32.totalorder %s39_s6, 2  ;;  %p55_p4 = scmp.ne.s32.totalorder %s733_s27, %s729_s26 }
  0x17   : > { %p56_p5 = scmp.eq.s32.totalorder %s745_s0, 0  ;;  %p61_p6 = scmp.ne.s32.totalorder %s729_s26, %s725_s25 }
  0x18   : > { %s1047_s6 = smov (%p41_p3, %s39_s6), 0  ;;  %p62_p8 = scmp.eq.s32.totalorder %s476_s30, 0 }
  0x19   : > { %p833_p7 = por %p56_p5, %p55_p4  ;;  %s43_s9 = ssub.s32 %s741_s29, %s1047_s6 }
  0x1a   : > { %p139_p9 = scmp.eq.s32.totalorder %s476_s30, 1  ;;  %p46_p10 = scmp.eq.s32.totalorder %s43_s9, 0 }
  0x1b   : > { %p839_p11 = por %p62_p8, %p61_p6  ;;  %p145_p13 = scmp.eq.s32.totalorder %s477_s5, 1 }
  0x1c   : > { %p843_p12 = por %p139_p9, %p55_p4  ;;  %p526_p2 = scmp.lt.s32.totalorder %s745_s0, 2 }
  0x1d   : > { %s1030_s10 = scalar_select %p839_p11, 1, 0 }
  0x1e   : > { %s1031_s11 = scalar_select %p843_p12, 1, 0 }
  0x1f   : > { %s848_s12 = scalar_select %p46_p10, %s733_s27, %s48_s7  }
  0x20   : > { %p850_p0 = por %p145_p13, %p61_p6  ;;  %s857_s14 = sand.u32 1, %s733_s27  }
  0x21   : > { %s480_s15 = sshll.u32 %s857_s14, 2  ;;  %s481_s16 = sshll.u32 %s741_s29, 6 }
  0x22   : > { %s1032_s13 = scalar_select %p850_p0, 1, 0 }
  0x23   : > { %s864_s19 = scalar_lea.hbm %s1023_s1, %s481_s16  ;;  %s169_s20 = scalar_lea.vmem [#allocation4], %s480_s15 }
  0x24   : > { %s177_s21 = sshll.u32 %s169_s20, 4  ;;  %p870_p3 = pnand %p526_p2, %p833_p7  ;;  %s866_s21 = int_to_ptr.vmem [resolvable:$true] %s177_s21 }
  0x25   : > { %s166_s23 = scalar_lea.sflag [#allocation5], %s857_s14  ;;  %s597_s24 = scalar_lea.hbm %s864_s19, 64 }
  0x26   : > { %p598_p6 = scmp.ne.s32.totalorder %s864_s19, %s597_s24  ;;  %p599_p8 = pneg %p870_p3 }
  0x27   : > { %s602_s7 = scalar_lea.hbm %s1023_s1, 128  ;;  %p603_p7 = scmp.lt.u32.totalorder %s864_s19, %s1023_s1 }
  0x28   : > { %p600_p9 = pnand %p599_p8, %p598_p6  ;;  %p604_p13 = scmp.lt.u32.totalorder %s602_s7, %s597_s24 }
  0x29   : > { %p606_p1 = scmp.lt.u32.totalorder %s597_s24, %s864_s19 }
  0x2a   : > { %p601_p10 = pneg %p600_p9  ;;  %p605_p2 = por %p604_p13, %p603_p7 }
  0x2c   : > { %p607_p4 = por %p606_p1, %p605_p2 }
  0x2e   : > { %p608_p5 = pnand %p607_p4, %p601_p10 }
  0x30   : > { %611 = shalt.err (!%p608_p5)
}
  0x31   : > { %s612_s15 = scalar_lea.vmem %s866_s21, 64  ;;  %s748_s16 = smov [#allocation4]  }
  0x32   : > { %p613_p6 = scmp.ne.s32.totalorder %s866_s21, %s612_s15  ;;  %s617_s17 = sshll.u32 %s748_s16, 4  ;;  %s618_s17 = int_to_ptr.vmem [resolvable:$false] %s617_s17 }
  0x33   : > { %s619_s18 = scalar_lea.vmem %s618_s17, 128  ;;  %p620_p12 = scmp.lt.s32.totalorder %s866_s21, %s618_s17 }
  0x34   : > { %p615_p9 = pnand %p613_p6, %p599_p8  ;;  %p621_p7 = scmp.lt.s32.totalorder %s619_s18, %s612_s15 }
  0x36   : > { %p616_p0 = pneg %p615_p9  ;;  %p622_p13 = por %p621_p7, %p620_p12 }
  0x38   : > { %p623_p1 = pnand %p622_p13, %p616_p0 }
  0x3a   : > { %626 = shalt.err (!%p623_p1)
}
  0x3b   : > { %518 = dma.hbm_to_vmem [thread:$0]  (!%p870_p3), %s864_s19, 64, %s866_s21, %s166_s23  }
  0x3c   : > { %p1034_p4 = scmp.lt.s32.totalorder %s745_s0, 3  ;;  %p1035_p5 = scmp.ge.s32.totalorder %s745_s0, 1 }
  0x3d   : > { %s482_s24 = sshll.u32 %s857_s14, 4  ;;  %s497_s30 = sshll.u32 %s741_s29, 8 }
  0x3e   : > { %p906_p10 = pnand %p1035_p5, %p1034_p4  ;;  %s915_s8 = scalar_lea.hbm %s1024_s2, %s497_s30 }
  0x3f   : > { %s188_s9 = scalar_lea.vmem [#allocation7], %s482_s24  ;;  %s185_s19 = scalar_lea.sflag [#allocation8], %s857_s14 }
  0x40   : > { %s195_s15 = sshll.u32 %s188_s9, 4  ;;  %s627_s21 = scalar_lea.hbm %s915_s8, 256  ;;  %s917_s15 = int_to_ptr.vmem [resolvable:$true] %s195_s15 }
  0x41   : > { %p628_p12 = scmp.ne.s32.totalorder %s915_s8, %s627_s21  ;;  %s632_s17 = scalar_lea.hbm %s1024_s2, 512 }
  0x42   : > { %p633_p6 = scmp.lt.u32.totalorder %s915_s8, %s1024_s2  ;;  %p634_p9 = scmp.lt.u32.totalorder %s632_s17, %s627_s21 }
  0x43   : > { %p630_p0 = pnand %p628_p12, %p599_p8  ;;  %p636_p13 = scmp.lt.u32.totalorder %s627_s21, %s915_s8 }
  0x44   : > { %p635_p7 = por %p634_p9, %p633_p6 }
  0x45   : > { %p631_p2 = pneg %p630_p0 }
  0x46   : > { %p637_p1 = por %p636_p13, %p635_p7 }
  0x48   : > { %p638_p4 = pnand %p637_p1, %p631_p2 }
  0x4a   : > { %641 = shalt.err (!%p638_p4)
}
  0x4b   : > { %s642_s24 = scalar_lea.vmem %s917_s15, 256  ;;  %s749_s5 = smov [#allocation7]  }
  0x4c   : > { %p643_p5 = scmp.ne.s32.totalorder %s917_s15, %s642_s24  ;;  %s647_s7 = sshll.u32 %s749_s5, 4  ;;  %s648_s7 = int_to_ptr.vmem [resolvable:$false] %s647_s7 }
  0x4d   : > { %s649_s9 = scalar_lea.vmem %s648_s7, 512  ;;  %p650_p11 = scmp.lt.s32.totalorder %s917_s15, %s648_s7 }
  0x4e   : > { %p645_p12 = pnand %p643_p5, %p599_p8  ;;  %p651_p6 = scmp.lt.s32.totalorder %s649_s9, %s642_s24 }
  0x50   : > { %p646_p0 = pneg %p645_p12  ;;  %p652_p9 = por %p651_p6, %p650_p11 }
  0x52   : > { %p653_p7 = pnand %p652_p9, %p646_p0 }
  0x54   : > { %656 = shalt.err (!%p653_p7)
}
  0x55   : > { %s750_s21 = smov 64   ;;  %s751_s23 = smov 4  }
  0x56   : > { %521 = dma.hbm_to_vmem [thread:$0]  (!%p870_p3), %s915_s8, 256, %s917_s15, %s185_s19, %s750_s21, %s750_s21, %s751_s23  }
  0x57   : > { %213 = sbr.rel (%p906_p10) target bundleno = 652 (0x28c), region = 32  ;;  %s948_s16 = sand.u32 (!%p906_p10), 1, %s729_s26  }
  0x58   : > { %s486_s17 = sshll.u32 (!%p906_p10), %s948_s16, 2  ;;  %s216_s18 = scalar_lea.sflag (!%p906_p10), [#allocation5], %s948_s16 }
  0x59   : > { %s219_s30 = scalar_lea.vmem (!%p906_p10), [#allocation4], %s486_s17  ;;  %p1037_p11 = scmp.ne.s32.totalorder (!%p906_p10), %s1030_s10, 0 }
  0x5e   : > { %712 = dma.done.wait (%p1037_p11), %s216_s18, 64  }
  0x5f   : > { %714 = vsyncadd (%p1037_p11), %s216_s18, 4294967232  ;;  %s487_s14 = sshll.u32 %s948_s16, 4  ;;  %s225_s22 = scalar_lea.sflag [#allocation8], %s948_s16 }
  0x60   : > { %s228_s20 = scalar_lea.vmem [#allocation7], %s487_s14 }
  0x61   : > { %716 = dma.done.wait (%p1037_p11), %s225_s22, 256  }
  0x62   : > { %718 = vsyncadd (%p1037_p11), %s225_s22, 4294967040  ;;  %v752_v0 = vmov 0.0   ;;  %vm753_vm0 = vmmov 0   ;;  %v581_v1 = vld [vmem:[%s228_s20] sm:$0xff]   ;;  %v582_v2 = vld [vmem:[%s228_s20 + $0x8] sm:$0xff]   ;;  %vm287_vm1 = vcmask 261120   ;;  %v332_v4 = vlaneseq }
  0x63   : > { %501 = vmatprep.subr.bf16.mxu0 %v752_v0  ;;  %505 = vmatprep.mubr.msk.bf16.mxu0 %vm753_vm0, %v752_v0  ;;  %v263_v3 = vld [vmem:[%s219_s30] sm:$0xf]  ;;  %p259_p3 = scmp.lt.s32.totalorder %s737_s28, 1  ;;  %s331_s8 = sld [smem:[#allocation3 + %s737_s28]] }
  0x64   : > { %502 = vmatpush3.bf16.msra.mxu0 %v581_v1  ;;  %v333_v5 = vand.u32 127, %v332_v4  ;;  %s488_s5 = sshll.u32 %s948_s16, 3  ;;  %s494_s7 = sshll.u32 %s737_s28, 7 }
  0x65   : > { %503 = vmatprep.subr.bf16.mxu0 %v752_v0  ;;  %s260_s15 = scalar_select %p259_p3, %s737_s28, 1 }
  0x66   : > { %s258_s9 = scalar_lea.vmem [#allocation9], %s488_s5  ;;  %s973_s18 = scalar_lea.hbm %s1026_s4, %s494_s7 }
  0x67   : > { %s261_s24 = scalar_lea.vmem %s1025_s3, %s260_s15  ;;  %s364_s21 = sshll.u32 %s258_s9, 4  ;;  %s975_s21 = int_to_ptr.vmem [resolvable:$true] %s364_s21 }
  0x68   : > { %504 = vmatpush3.bf16.msra.mxu0 %v582_v2  ;;  %v489_v7 = vld [vmem:[%s261_s24] ss:$0 sm:$0xff]  ;;  %s350_s30 = scalar_lea.sflag [#allocation6], %s948_s16  ;;  %s657_s14 = scalar_lea.vmem %s975_s21, 128 }
  0x69   : > { %v334_v6 = vstv %s331_s8  ;;  %p658_p8 = scmp.ne.s32.totalorder %s975_s21, %s657_s14  ;;  %p1038_p10 = scmp.ne.s32.totalorder %s1031_s11, 0 }
  0x6a   : > { %vm335_vm2 = vcmp.lt.s32.totalorder %v333_v5, %v334_v6  ;;  %s754_s28 = smov [#allocation9]  }
  0x6b   : > { %506 = vmatmul.mubr.msk.bf16.vlgmr.msra.gmra.mrb[0].mxu0 %vm287_vm1, %v263_v3  ;;  %p659_p2 = pnand %p658_p8, %p1038_p10  ;;  %s661_s22 = sshll.u32 %s754_s28, 4  ;;  %s662_s22 = int_to_ptr.vmem [resolvable:$false] %s661_s22 }
  0x6c   : > { %s663_s20 = scalar_lea.vmem %s662_s22, 256  ;;  %p664_p1 = scmp.lt.s32.totalorder %s975_s21, %s662_s22 }
  0x6d   : > { %p660_p13 = pneg %p659_p2  ;;  %p665_p4 = scmp.lt.s32.totalorder %s663_s20, %s657_s14 }
  0x6f   : > { %p666_p5 = por %p665_p4, %p664_p1 }
  0x71   : > { %p667_p12 = pnand %p666_p5, %p660_p13 }
 0x13e   : > { %v325_v8 = vpop.f32.mrb[0].mxu0 }
 0x13f   : > { %v326_v9 = vadd.f32 %v489_v7, %v325_v8  ;;  %v507_v10 = vpop.f32.mrb[1].mxu0 }
 0x140   : > { %v328_v11 = vpop.f32.mrb[2].mxu0 }
 0x141   : > { %v508_v12 = vpop.f32.mrb[3].mxu0  ;;  %v336_v13 = vsel %vm335_vm2, %v326_v9, -1e+30 }
 0x142   : > { %337 = vmax.xlane.f32.xlu0 %v336_v13 }
 0x1cf   : > { %v338_v14 = vpop.xlane.xlu0 %337 }
 0x1d0   : > { %v339_v15 = vsub.f32 %v336_v13, %v338_v14 }
 0x1d2   : > { %v340_v16 = vmul.f32 1.442695, %v339_v15 }
 0x1d4   : > { %583 = vpow2.f32 %v340_v16 }
 0x1de   : > { %v584_v17 = vpop.eup %583 }
 0x1df   : > { %342 = vadd.xlane.f32.xlu0 %v584_v17 }
 0x26c   : > { %v343_v18 = vpop.xlane.xlu0 %342 }
 0x26d   : > { %585 = vlog2.f32 %v343_v18 }
 0x277   : > { %v586_v19 = vpop.eup %585 }
 0x278   : > { %v345_v20 = vmul.f32 0.6931472, %v586_v19 }
 0x27a   : > { %v346_v21 = vadd.f32 %v345_v20, %v338_v14 }
 0x27c   : > { %v347_v22 = vsub.f32 %v336_v13, %v346_v21 }
 0x27e   : > { %348 = vst [vmem:[%s258_s9] sm:$0xff] %v347_v22 }
 0x27f   : > { %670 = shalt.err (!%p667_p12)
}
 0x280   : > { %s671_s16 = scalar_lea.hbm %s973_s18, 128  ;;  %s675_s10 = scalar_lea.hbm %s1026_s4, 256 }
 0x281   : > { %p672_p0 = scmp.ne.s32.totalorder %s973_s18, %s671_s16  ;;  %p676_p7 = scmp.lt.u32.totalorder %s973_s18, %s1026_s4 }
 0x282   : > { %p677_p11 = scmp.lt.u32.totalorder %s675_s10, %s671_s16  ;;  %p679_p8 = scmp.lt.u32.totalorder %s671_s16, %s973_s18 }
 0x283   : > { %p673_p6 = pnand %p672_p0, %p1038_p10 }
 0x284   : > { %p678_p3 = por %p677_p11, %p676_p7 }
 0x285   : > { %p674_p9 = pneg %p673_p6 }
 0x286   : > { %p680_p2 = por %p679_p8, %p678_p3 }
 0x288   : > { %p681_p13 = pnand %p680_p2, %p674_p9 }
 0x28a   : > { %684 = shalt.err (!%p681_p13)
}
 0x28b   : > { %513 = dma.vmem_to_hbm [thread:$0]  (%p1038_p10), %s975_s21, 128, %s973_s18, %s350_s30  }
 0x28c PF: > { %s376_s5 = sand.u32 1, %s725_s25   ;;  %p1039_p1 = scmp.ne.s32.totalorder %s1032_s13, 0 }
 0x28d   : > { %p1040_p4 = scmp.ge.s32.totalorder %s745_s0, 2  ;;  %s377_s7 = scalar_lea.sflag [#allocation6], %s376_s5 }
 0x28f   : > { %p523_p5 = pnand %p1040_p4, %p1039_p1 }
 0x291   : > { %720 = dma.done.wait (!%p523_p5), %s377_s7, 128  }
 0x292   : > { %722 = vsyncadd (!%p523_p5), %s377_s7, 4294967168  ;;  %s27_s0 = sadd.s32 1, %s745_s0   ;;  %s1041_s25 = smov %s729_s26 }
 0x293   : > { %p24_p12 = scmp.ge.s32.totalorder %s27_s0, 4   ;;  %s1042_s26 = smov %s733_s27 }
 0x294   : > { %s1043_s27 = smov %s848_s12  ;;  %s1044_s28 = smov %s741_s29 }
 0x295   : > { %s1045_s29 = smov %s1047_s6  ;;  %26 = sbr.rel (!%p24_p12) target bundleno = 20 (0x14), region = 93 }
 0x29c   :  { %382 = vsyncpa [#allocation5], 1 }
 0x29d   :  { %384 = vsyncpa [#allocation5 + $0x1], 1 }
 0x29e   :  { %385 = vsyncpa [#allocation8], 1 }
 0x29f   :  { %387 = vsyncpa [#allocation8 + $0x1], 1 }
 0x2a0   :  { %388 = vsyncpa [#allocation6], 1 }
 0x2a1   :  { %390 = vsyncpa [#allocation6 + $0x1], 1 }

</bundles_post_ra>
